<compile_context>
chip_gen: v7x
topology: tpu7x:2x2x1
jax: 0.10.0
libtpu: 0.0.40
codegen_flags: <defaults>
</compile_context>

<pallas_src>
import jax
import jax.numpy as jnp
from jax.experimental import pallas as pl
from jax.experimental.pallas import tpu as pltpu


def _color_proj_kernel(x_ref, o_ref):
    # x_ref / o_ref: (3, th, Wb) tile — channels full, rows blocked, lane-dense.
    r = x_ref[0].astype(jnp.float32)
    g = x_ref[1].astype(jnp.float32)
    b = x_ref[2].astype(jnp.float32)
    # B = [[ 5/6, 1/3, -1/6],
    #      [ 1/3, 1/3,  1/3],
    #      [-1/6, 1/3,  5/6]]  ==  m ± d with m=(r+g+b)/3, d=(r-b)/2
    m = (r + g + b) * (1.0 / 3.0)
    d = (r - b) * 0.5
    o_ref[0] = (m + d).astype(o_ref.dtype)
    o_ref[1] = m.astype(o_ref.dtype)
    o_ref[2] = (m - d).astype(o_ref.dtype)


def _round_up(x: int, m: int) -> int:
    return ((x + m - 1) // m) * m


def _round_down(x: int, m: int) -> int:
    return (x // m) * m


def _vmem_capacity_bytes() -> int:
    try:
        return int(pltpu.get_tpu_info().vmem_capacity_bytes)
    except Exception:
        return 128 * 1024 * 1024  # v5e/v6e default


def color_projection(img: jax.Array, *, block_rows: int | None = None) -> jax.Array:
    """Apply the green-magenta color projection to a CHW image.

    img: array of shape (3, H, W) (float32 / bfloat16).
    Returns an array of shape (3, H, W), same dtype as img.
    """
    assert img.ndim == 3 and img.shape[0] == 3, "expected CHW RGB image"
    C, H, W = img.shape
    itemsize = jnp.dtype(img.dtype).itemsize

    # --- generation-aware sizing -------------------------------------------
    vmem_cap = _vmem_capacity_bytes()
    if vmem_cap <= 64 * 1024 * 1024:       # v7x-class: 64 MiB VMEM per TC
        target_block_bytes = 10 * 1024 * 1024
    else:                                   # v5e / v6e: 128 MiB VMEM
        target_block_bytes = 16 * 1024 * 1024

    # --- lane-dense view for non-128-multiple widths ------------------------
    lane_retile = (W % 128) != 0
    if lane_retile:
        flat = img.reshape(C, H * W)
        n_pad = _round_up(H * W, 128) - (H * W)
        if n_pad:
            flat = jnp.pad(flat, ((0, 0), (0, n_pad)))
        x = flat.reshape(C, -1, 128)
    else:
        x = img
    _, He, We = x.shape

    # --- dtype-aware sublane multiple & row-block sizing ---------------------
    sub = {1: 32, 2: 16}.get(itemsize, 8)

    if block_rows is None:
        bytes_per_row = max(C * We * itemsize, 1)
        th = max(sub, _round_down(target_block_bytes // bytes_per_row, sub))
        # Never collapse the grid to 1: aim for >= 4 pipeline steps so DMA and
        # compute overlap and v7x can shard the parallel axis across 2 TCs.
        th_steps = max(sub, _round_up(pl.cdiv(He, 4), sub))
        th = min(th, th_steps)
    else:
        th = max(sub, _round_up(block_rows, sub))
    if th >= He:
        th = He  # full second-last dim always satisfies the (8,128) rule

    grid = (pl.cdiv(He, th),)  # ragged tail masked on write by Pallas

    # 2x in + 2x out double-buffers plus headroom, clamped to physical VMEM.
    block_bytes = C * th * We * itemsize
    vmem_limit = min(vmem_cap - 8 * 1024 * 1024,
                     max(32 * 1024 * 1024, 4 * block_bytes + 8 * 1024 * 1024))

    out = pl.pallas_call(
        _color_proj_kernel,
        out_shape=jax.ShapeDtypeStruct(x.shape, img.dtype),
        grid_spec=pltpu.PrefetchScalarGridSpec(
            num_scalar_prefetch=0,
            grid=grid,
            in_specs=[pl.BlockSpec((C, th, We), lambda i: (0, i, 0))],
            out_specs=pl.BlockSpec((C, th, We), lambda i: (0, i, 0)),
        ),
        compiler_params=pltpu.CompilerParams(
            dimension_semantics=("parallel",),
            vmem_limit_bytes=int(vmem_limit),
        ),
        cost_estimate=pl.CostEstimate(
            flops=7 * H * W,
            transcendentals=0,
            bytes_accessed=2 * C * H * W * itemsize,
        ),
    )(x)

    if lane_retile:
        out = out.reshape(C, -1)[:, :H * W].reshape(C, H, W)
    return out


def _reference(img):
    a = jnp.array([[1.0, -2.0, 1.0],
                   [-2.0, 4.0, -2.0],
                   [1.0, -2.0, 1.0]], dtype=jnp.float32)
    B = jnp.eye(3, dtype=jnp.float32) - a / 6.0
    return jnp.einsum('ij,jhw->ihw', B, img.astype(jnp.float32)).astype(img.dtype)


if __name__ == "__main__":
    key = jax.random.PRNGKey(0)
    k1, k2, k3, k4 = jax.random.split(key, 4)

    # Auto-sized blocks, multi-step grid with ragged last row-block.
    img1 = jax.random.uniform(k1, (3, 36, 128), dtype=jnp.float32)
    out1 = color_projection(img1)
    jax.block_until_ready(out1)
    assert out1.shape == img1.shape
    assert jnp.allclose(out1, _reference(img1), atol=1e-5, rtol=1e-5)

    # Explicit small block_rows (grid=5, ragged tail).
    out1b = color_projection(img1, block_rows=8)
    jax.block_until_ready(out1b)
    assert jnp.allclose(out1b, _reference(img1), atol=1e-5, rtol=1e-5)

    # Narrow / non-128-multiple width -> lane-dense retiling path (with flat pad).
    img2 = jax.random.uniform(k2, (3, 17, 50), dtype=jnp.float32)
    out2 = color_projection(img2)
    jax.block_until_ready(out2)
    assert out2.shape == img2.shape
    assert jnp.allclose(out2, _reference(img2), atol=1e-5, rtol=1e-5)

    # bfloat16 input: dtype-aware (multiple-of-16) sublane rounding.
    img3 = jax.random.uniform(k3, (3, 64, 256), dtype=jnp.float32).astype(jnp.bfloat16)
    out3 = color_projection(img3)
    jax.block_until_ready(out3)
    assert out3.shape == img3.shape
    assert jnp.allclose(out3.astype(jnp.float32),
                        _reference(img3).astype(jnp.float32),
                        atol=2e-2, rtol=2e-2)

    print("KERNEL_OK")
</pallas_src>

<mosaic_0001>
module attributes {stable_mosaic.version = 11 : i64} {
  func.func @_color_proj_kernel(%arg0: i32, %arg1: memref<3x16x128xf32, #tpu.memory_space<vmem>>, %arg2: memref<3x16x128xf32, #tpu.memory_space<vmem>>) attributes {dimension_semantics = [#tpu.dimension_semantics<parallel>], iteration_bounds = array<i64: 3>, scalar_prefetch = 0 : i64, scratch_operands = 0 : i64, tpu.core_type = #tpu.core_type<tc>, window_params = [{transform_indices = @transform_0, window_bounds = array<i64: 3, 16, 128>}, {transform_indices = @transform_1, window_bounds = array<i64: 3, 16, 128>}]} {
    %c0 = arith.constant 0 : index
    %c0_0 = arith.constant 0 : index
    %c0_1 = arith.constant 0 : index
    %0 = vector.load %arg1[%c0, %c0_0, %c0_1] : memref<3x16x128xf32, #tpu.memory_space<vmem>>, vector<1x16x128xf32>
    %1 = vector.shape_cast %0 : vector<1x16x128xf32> to vector<16x128xf32>
    %c1 = arith.constant 1 : index
    %c0_2 = arith.constant 0 : index
    %c0_3 = arith.constant 0 : index
    %2 = vector.load %arg1[%c1, %c0_2, %c0_3] : memref<3x16x128xf32, #tpu.memory_space<vmem>>, vector<1x16x128xf32>
    %3 = vector.shape_cast %2 : vector<1x16x128xf32> to vector<16x128xf32>
    %c2 = arith.constant 2 : index
    %c0_4 = arith.constant 0 : index
    %c0_5 = arith.constant 0 : index
    %4 = vector.load %arg1[%c2, %c0_4, %c0_5] : memref<3x16x128xf32, #tpu.memory_space<vmem>>, vector<1x16x128xf32>
    %5 = vector.shape_cast %4 : vector<1x16x128xf32> to vector<16x128xf32>
    %6 = arith.addf %1, %3 : vector<16x128xf32>
    %7 = arith.addf %6, %5 : vector<16x128xf32>
    %cst = arith.constant 0.333333343 : f32
    %8 = vector.broadcast %cst : f32 to vector<16x128xf32>
    %9 = arith.mulf %7, %8 : vector<16x128xf32>
    %10 = arith.subf %1, %5 : vector<16x128xf32>
    %cst_6 = arith.constant 5.000000e-01 : f32
    %11 = vector.broadcast %cst_6 : f32 to vector<16x128xf32>
    %12 = arith.mulf %10, %11 : vector<16x128xf32>
    %13 = arith.addf %9, %12 : vector<16x128xf32>
    %c0_7 = arith.constant 0 : index
    %c0_8 = arith.constant 0 : index
    %c0_9 = arith.constant 0 : index
    %14 = vector.load %arg2[%c0_7, %c0_8, %c0_9] : memref<3x16x128xf32, #tpu.memory_space<vmem>>, vector<1x16x128xf32>
    %15 = vector.shape_cast %14 : vector<1x16x128xf32> to vector<16x128xf32>
    %16 = vector.shape_cast %13 : vector<16x128xf32> to vector<1x16x128xf32>
    tpu.vector_store %arg2[%c0_7, %c0_8, %c0_9], %16 {strides = array<i32>} : memref<3x16x128xf32, #tpu.memory_space<vmem>>, vector<1x16x128xf32>,
    %c1_10 = arith.constant 1 : index
    %c0_11 = arith.constant 0 : index
    %c0_12 = arith.constant 0 : index
    %17 = vector.load %arg2[%c1_10, %c0_11, %c0_12] : memref<3x16x128xf32, #tpu.memory_space<vmem>>, vector<1x16x128xf32>
    %18 = vector.shape_cast %17 : vector<1x16x128xf32> to vector<16x128xf32>
    %19 = vector.shape_cast %9 : vector<16x128xf32> to vector<1x16x128xf32>
    tpu.vector_store %arg2[%c1_10, %c0_11, %c0_12], %19 {strides = array<i32>} : memref<3x16x128xf32, #tpu.memory_space<vmem>>, vector<1x16x128xf32>,
    %20 = arith.subf %9, %12 : vector<16x128xf32>
    %c2_13 = arith.constant 2 : index
    %c0_14 = arith.constant 0 : index
    %c0_15 = arith.constant 0 : index
    %21 = vector.load %arg2[%c2_13, %c0_14, %c0_15] : memref<3x16x128xf32, #tpu.memory_space<vmem>>, vector<1x16x128xf32>
    %22 = vector.shape_cast %21 : vector<1x16x128xf32> to vector<16x128xf32>
    %23 = vector.shape_cast %20 : vector<16x128xf32> to vector<1x16x128xf32>
    tpu.vector_store %arg2[%c2_13, %c0_14, %c0_15], %23 {strides = array<i32>} : memref<3x16x128xf32, #tpu.memory_space<vmem>>, vector<1x16x128xf32>,
    return
  }
  func.func @transform_0(%arg0: i32) -> (i32, i32, i32) {
    %c0_i32 = arith.constant 0 : i32
    %c0_i32_0 = arith.constant 0 : i32
    %c0_i32_1 = arith.constant 0 : i32
    return %c0_i32, %arg0, %c0_i32_0 : i32, i32, i32
  }
  func.func @transform_1(%arg0: i32) -> (i32, i32, i32) {
    %c0_i32 = arith.constant 0 : i32
    %c0_i32_0 = arith.constant 0 : i32
    %c0_i32_1 = arith.constant 0 : i32
    return %c0_i32, %arg0, %c0_i32_0 : i32, i32, i32
  }
}

</mosaic_0001>

<bundles_post_ra>
// kernel: tpu_custom_call.1
= control target key start
LH: loop header
LB: loop body
LE: loop exit
PB: predicated region body
PF: predicated region fallthrough
CT: control target
= control target key end

     0   :  { %6 = vsyncpa [#allocation3], 0  ;;  %s574_s0 = inlined_call_operand.hbm [shape: f32[3,36,128], index: 0, kind: input, shape index: {}]   ;;  %s575_s1 = inlined_call_operand.hbm [shape: f32[3,36,128], index: 1, kind: output, shape index: {}]  }
   0x1   :  { %8 = vsyncpa [#allocation3 + $0x1], 0 }
   0x2   :  { %9 = vsyncpa [#allocation4], 0 }
   0x3   :  { %11 = vsyncpa [#allocation4 + $0x1], 0  ;;  %s473_s6 = smov 0   ;;  %s475_s7 = smov 0  }
   0x4   :  { %s477_s8 = smov 0   ;;  %s479_s9 = smov 0  }
   0x5 LB: > { %s494_s10 = sadd.s32 4294967295, %s450_s9   ;;  %s330_s11 = sadd.s32 4294967294, %s450_s9   ;;  %s450_s9 = sphi %s479_s9, %s582_s9   ;;  %s446_s8 = sphi %s477_s8, %s581_s8   ;;  %s442_s7 = sphi %s475_s7, %s580_s7   ;;  %s438_s6 = sphi %s473_s6, %s579_s6  }
   0x6   : > { %s498_s12 = sadd.s32 1, %s450_s9   ;;  %s24_s13 = sadd.s32 1, %s446_s8 }
   0x7   : > { %s21_s14 = ssub.s32 %s450_s9, %s498_s12  ;;  %p31_p0 = scmp.ne.s32.totalorder %s446_s8, %s442_s7 }
   0x8   : > { %p22_p1 = scmp.eq.s32.totalorder %s21_s14, 0  ;;  %p32_p2 = scmp.eq.s32.totalorder %s450_s9, 0 }
   0x9   : > { %p37_p3 = scmp.ne.s32.totalorder %s442_s7, %s438_s6  ;;  %p38_p4 = scmp.eq.s32.totalorder %s494_s10, 0 }
   0xa   : > { %s510_s15 = scalar_select %p22_p1, %s446_s8, %s24_s13  }
   0xb   : > { %p33_p5 = por %p32_p2, %p31_p0  ;;  %p512_p6 = por %p38_p4, %p37_p3 }
   0xc   : > { %p61_p7 = scmp.eq.s32.totalorder %s494_s10, 2  ;;  %p67_p8 = scmp.eq.s32.totalorder %s330_s11, 2 }
   0xd   : > { %p332_p11 = scmp.ge.s32.totalorder %s450_s9, 3 }
   0xe   : > { %p517_p9 = por %p61_p7, %p31_p0  ;;  %p521_p10 = por %p67_p8, %p37_p3 }
   0xf   : > { %83 = sbr.rel (%p332_p11) target bundleno = 47 (0x2f), region = 16 }
  0x16   : > { %86 = sbr.rel (!%p33_p5) target bundleno = 47 (0x2f), region = 20 }
  0x1d   : > { %s87_s19 = sand.u32 1, %s446_s8   ;;  %s333_s20 = sshll.u32 %s450_s9, 1 }
  0x1e   : > { %s360_s21 = smul.u32 48, %s87_s19  ;;  %s93_s22 = ssub.s32 5, %s333_s20 }
  0x1f   : > { %p94_p12 = scmp.lt.s32.totalorder %s93_s22, 2  ;;  %s88_s25 = scalar_lea.sflag [#allocation3], %s87_s19 }
  0x20   : > { %s91_s26 = scalar_lea.vmem [#allocation2], %s360_s21 }
  0x21   : > { %s584_s22 = smov (!%p94_p12, %s93_s22), 2 }
  0x22   : > { %s96_s23 = smul.u32 384, %s584_s22 }
  0x24   : > { %s98_s24 = ssub.s32 768, %s96_s23 }
  0x25   : > { %99 = vsyncadd %s88_s25, %s98_s24  ;;  %p334_p13 = scmp.ne.s32.totalorder %s96_s23, 0  ;;  %s358_s27 = sshll.u32 %s450_s9, 8 }
  0x26   : > { %s102_s30 = scalar_lea.hbm %s574_s0, %s358_s27  ;;  %s109_s2 = sld [smem:[#allocation0]]  }
  0x27   : > { %s117_s3 = sshll.u32 %s91_s26, 4  ;;  %s452_s4 = smov 640   ;;  %s118_s3 = int_to_ptr.vmem [resolvable:$true] %s117_s3 }
  0x28   : > { %124 = sst [smem:[#allocation7]] %s452_s4  ;;  %s453_s5 = smov 256  }
  0x29   : > { %128 = sst [smem:[#allocation7 + $0x2]] %s584_s22  ;;  %s454_s11 = smov 128  }
  0x2a   : > { %126 = sst [smem:[#allocation7 + $0x1]] %s453_s5  ;;  %s455_s19 = smov 8  }
  0x2b   : > { %130 = sst [smem:[#allocation7 + $0x3]] %s454_s11  ;;  %s456_s20 = smov [#allocation6]  }
  0x2c   : > { %s338_s13 = sshll.u32 %s109_s2, 26  ;;  %132 = sst [smem:[#allocation7 + $0x4]] %s454_s11 }
  0x2d   : > { %s339_s14 = sadd.s32 134217728, %s338_s13  ;;  %134 = sst [smem:[#allocation7 + $0x5]] %s455_s19 }
  0x2e   : > { %136 = dma.general (%p334_p13), %s102_s30, %s96_s23, %s118_s3, %s88_s25, %s456_s20, [#allocation7], %s339_s14, 0  }
  0x2f PF: > { %p341_p0 = scmp.ge.s32.totalorder %s450_s9, 1  ;;  %p138_p1 = scmp.lt.s32.totalorder %s450_s9, 4 }
  0x31   : > { %p139_p2 = pnand %p341_p0, %p138_p1 }
  0x32   : > { %s536_s21 = sand.u32 (!%p139_p2), 1, %s442_s7  }
  0x33   : > { %142 = sbr.rel (%p139_p2) target bundleno = 88 (0x58), region = 24  ;;  %s145_s24 = scalar_lea.sflag (!%p139_p2), [#allocation3], %s536_s21 }
  0x34   : > { %s361_s22 = smul.u32 (!%p139_p2), 48, %s536_s21 }
  0x36   : > { %s148_s26 = scalar_lea.vmem (!%p139_p2), [#allocation2], %s361_s22 }
  0x3a   : > { %429 = dma.done.wait (%p512_p6), %s145_s24, 768  }
  0x3b   : > { %431 = vsyncadd (%p512_p6), %s145_s24, 4294966528  ;;  %v177_v0 = vld [vmem:[%s148_s26] sm:$0xff]  ;;  %v342_v1 = vld [vmem:[%s148_s26 + $0x10] sm:$0xff]  ;;  %s166_s16 = scalar_lea.vmem [#allocation5], %s361_s22  ;;  %s208_s23 = scalar_lea.sflag [#allocation4], %s536_s21 }
  0x3c   : > { %v344_v2 = vld [vmem:[%s148_s26 + $0x20] sm:$0xff]  ;;  %v185_v3 = vadd.f32 %v342_v1, %v177_v0  ;;  %v178_v5 = vld [vmem:[%s148_s26 + $0x8] sm:$0xff]  ;;  %v343_v6 = vld [vmem:[%s148_s26 + $0x18] sm:$0xff] }
  0x3d   : > { %v191_v4 = vsub.f32 %v177_v0, %v344_v2  ;;  %v345_v7 = vld [vmem:[%s148_s26 + $0x28] sm:$0xff]  ;;  %v186_v8 = vadd.f32 %v343_v6, %v178_v5 }
  0x3e   : > { %v192_v9 = vsub.f32 %v178_v5, %v345_v7  ;;  %v187_v10 = vadd.f32 %v344_v2, %v185_v3 }
  0x3f   : > { %v193_v11 = vmul.f32 0.5, %v191_v4  ;;  %v188_v12 = vadd.f32 %v345_v7, %v186_v8  ;;  %214 = sbr.rel (!%p517_p9) target bundleno = 88 (0x58), region = 32 }
  0x40   : > { %v194_v13 = vmul.f32 0.5, %v192_v9  ;;  %v189_v14 = vmul.f32 0.33333334, %v187_v10 }
  0x41   : > { %v190_v15 = vmul.f32 0.33333334, %v188_v12 }
  0x42   : > { %v195_v16 = vadd.f32 %v193_v11, %v189_v14  ;;  %346 = vst [vmem:[%s166_s16 + $0x10] sm:$0xff] %v189_v14  ;;  %v202_v17 = vsub.f32 %v189_v14, %v193_v11 }
  0x43   : > { %v196_v18 = vadd.f32 %v194_v13, %v190_v15  ;;  %347 = vst [vmem:[%s166_s16 + $0x18] sm:$0xff] %v190_v15  ;;  %v203_v19 = vsub.f32 %v190_v15, %v194_v13 }
  0x44   : > { %197 = vst [vmem:[%s166_s16] sm:$0xff] %v195_v16  ;;  %348 = vst [vmem:[%s166_s16 + $0x20] sm:$0xff] %v202_v17 }
  0x45   : > { %198 = vst [vmem:[%s166_s16 + $0x8] sm:$0xff] %v196_v18  ;;  %349 = vst [vmem:[%s166_s16 + $0x28] sm:$0xff] %v203_v19 }
  0x46   : > { %s350_s25 = sshll.u32 %s494_s10, 1 }
  0x47   : > { %s216_s27 = ssub.s32 5, %s350_s25 }
  0x48   : > { %p217_p3 = scmp.lt.s32.totalorder %s216_s27, 2 }
  0x4a   : > { %s586_s27 = smov (!%p217_p3, %s216_s27), 2 }
  0x4b   : > { %s219_s28 = smul.u32 384, %s586_s27 }
  0x4d   : > { %s221_s29 = ssub.s32 768, %s219_s28 }
  0x4e   : > { %222 = vsyncadd %s208_s23, %s221_s29  ;;  %p351_p4 = scmp.ne.s32.totalorder %s219_s28, 0  ;;  %s359_s30 = sshll.u32 %s494_s10, 8 }
  0x4f   : > { %s225_s4 = scalar_lea.hbm %s575_s1, %s359_s30  ;;  %s244_s17 = sshll.u32 %s166_s16, 4  ;;  %s245_s17 = int_to_ptr.vmem [resolvable:$true] %s244_s17 }
  0x50   : > { %s457_s5 = smov 256   ;;  %s458_s11 = smov 640  }
  0x51   : > { %251 = sst [smem:[#allocation9]] %s457_s5  ;;  %s459_s13 = smov 128  }
  0x52   : > { %253 = sst [smem:[#allocation9 + $0x1]] %s458_s11  ;;  %s460_s14 = smov 8  }
  0x53   : > { %255 = sst [smem:[#allocation9 + $0x2]] %s586_s27  ;;  %s461_s19 = smov [#allocation8]  }
  0x54   : > { %257 = sst [smem:[#allocation9 + $0x3]] %s459_s13  ;;  %s462_s20 = smov 0  }
  0x55   : > { %259 = sst [smem:[#allocation9 + $0x4]] %s459_s13 }
  0x56   : > { %261 = sst [smem:[#allocation9 + $0x5]] %s460_s14 }
  0x57   : > { %263 = dma.general (%p351_p4), %s245_s17, %s219_s28, %s225_s4, %s208_s23, %s461_s19, [#allocation9], %s462_s20, 0  }
  0x58 PF: > { %p368_p5 = scmp.ge.s32.totalorder %s450_s9, 2  ;;  %s272_s10 = sand.u32 1, %s438_s6  }
  0x59   : > { %s273_s22 = scalar_lea.sflag [#allocation4], %s272_s10 }
  0x5a   : > { %p365_p6 = pnand %p368_p5, %p521_p10 }
  0x5c   : > { %433 = dma.done.wait (!%p365_p6), %s273_s22, 768  }
  0x5d   : > { %435 = vsyncadd (!%p365_p6), %s273_s22, 4294966528  ;;  %p14_p7 = scmp.ge.s32.totalorder %s498_s12, 5   ;;  %s579_s6 = smov %s442_s7 }
  0x5e   : > { %s580_s7 = smov %s446_s8  ;;  %s581_s8 = smov %s510_s15 }
  0x5f   : > { %s582_s9 = smov %s498_s12  ;;  %16 = sbr.rel (!%p14_p7) target bundleno = 5 (0x5), region = 83 }
  0x66   :  { %278 = vsyncpa [#allocation3], 1 }
  0x67   :  { %280 = vsyncpa [#allocation3 + $0x1], 1 }
  0x68   :  { %281 = vsyncpa [#allocation4], 1 }
  0x69   :  { %283 = vsyncpa [#allocation4 + $0x1], 1 }

</bundles_post_ra>
